<compile_context>
chip_gen: v6e
topology: v6e:2x2x1
jax: 0.10.0
libtpu: 0.0.40
codegen_flags: <defaults>
</compile_context>

<pallas_src>
import jax
import jax.numpy as jnp
from jax.experimental import pallas as pl
from jax.experimental.pallas import tpu as pltpu

BN_EPS = 1e-5
IN_DIM = 24
HIDDEN = 32      # packed feature width (every layer zero-padded to this)
OUT_DIM = 4
NUM_LAYERS = 4


# ----------------------------------------------------------------------------
# Kernel
# ----------------------------------------------------------------------------
def _mlp_kernel(x_ref, w_ref, b_ref, o_ref):
    """Fused 4-layer MLP:  relu( ... relu(x @ W0 + b0) ... @ W3 + b3 ).

    x_ref : (B, 32)       bf16  (input, zero-padded 24 -> 32)
    w_ref : (4, 32, 32)   bf16  (BN-folded, zero-padded weights, stored (in,out))
    b_ref : (4, 1, 32)    f32   (BN-folded, zero-padded biases)
    o_ref : (B, 32)       f32   (columns >= 4 are zero; sliced in the wrapper)
    """
    h = x_ref[...]                                                  # bf16
    for i in range(NUM_LAYERS):                                     # static unroll
        acc = jnp.dot(h, w_ref[i], preferred_element_type=jnp.float32)  # MXU, f32 acc
        acc = jnp.maximum(acc + b_ref[i], 0.0)                      # f32 bias + ReLU (VPU)
        h = acc.astype(jnp.bfloat16) if i < NUM_LAYERS - 1 else acc
    o_ref[...] = h


# ----------------------------------------------------------------------------
# Wrapper
# ----------------------------------------------------------------------------
@jax.jit
def neural_network_forward(x, w_packed, b_packed):
    """Fused forward pass. x: (B, 24) f32. Returns (B, 4) f32."""
    batch, in_dim = x.shape
    # Zero-pad the activation to the packed width (matches zero-padded W rows).
    x_pad = jnp.zeros((batch, HIDDEN), jnp.bfloat16)
    x_pad = x_pad.at[:, :in_dim].set(x.astype(jnp.bfloat16))

    vmem = pl.BlockSpec(memory_space=pltpu.MemorySpace.VMEM)
    out = pl.pallas_call(
        _mlp_kernel,
        out_shape=jax.ShapeDtypeStruct((batch, HIDDEN), jnp.float32),
        in_specs=[vmem, vmem, vmem],
        out_specs=vmem,
    )(x_pad, w_packed, b_packed)
    return out[:, :OUT_DIM]


def fold_and_pack(p):
    """Host-side, once: fold eval-mode BatchNorm into the next Linear and pack
    everything into one bf16 weight tensor + one f32 bias tensor."""
    def fold(g, be, m, v, w, b):
        scale = g * jax.lax.rsqrt(v + BN_EPS)          # (1, H)
        w_f = scale.reshape(-1, 1) * w                 # diag(scale) @ W
        b_f = (be - m * scale) @ w + b                 # (1, H_out)
        return w_f, b_f

    w2f, b2f = fold(p["g1"], p["be1"], p["m1"], p["v1"], p["w2"], p["b2"])
    w3f, b3f = fold(p["g2"], p["be2"], p["m2"], p["v2"], p["w3"], p["b3"])

    def pad_w(w):
        out = jnp.zeros((HIDDEN, HIDDEN), jnp.float32)
        return out.at[: w.shape[0], : w.shape[1]].set(w)

    def pad_b(b):
        out = jnp.zeros((1, HIDDEN), jnp.float32)
        return out.at[:, : b.shape[1]].set(b)

    w_packed = jnp.stack(
        [pad_w(p["w1"]), pad_w(w2f), pad_w(w3f), pad_w(p["w4"])]
    ).astype(jnp.bfloat16)                                         # (4, 32, 32) bf16
    b_packed = jnp.stack(
        [pad_b(p["b1"]), pad_b(b2f), pad_b(b3f), pad_b(p["b4"])]
    )                                                              # (4, 1, 32) f32
    return w_packed, b_packed


# ----------------------------------------------------------------------------
# Parameter init (synthetic; shapes match the torch module, eval-mode BN stats)
# ----------------------------------------------------------------------------
def init_params(key, in_dim=IN_DIM, hidden=HIDDEN, out_dim=OUT_DIM):
    ks = jax.random.split(key, 8)

    def lin(k, fan_in, fan_out):
        bound = 1.0 / jnp.sqrt(fan_in)
        kw, kb = jax.random.split(k)
        w = jax.random.uniform(kw, (fan_in, fan_out), jnp.float32, -bound, bound)
        b = jax.random.uniform(kb, (1, fan_out), jnp.float32, -bound, bound)
        return w, b

    w1, b1 = lin(ks[0], in_dim, hidden)
    w2, b2 = lin(ks[1], hidden, hidden)
    w3, b3 = lin(ks[2], hidden, hidden)
    w4, b4 = lin(ks[3], hidden, out_dim)

    def bn(k, dim):
        kg, kb, km, kv = jax.random.split(k, 4)
        g = 1.0 + 0.1 * jax.random.normal(kg, (1, dim), jnp.float32)
        be = 0.1 * jax.random.normal(kb, (1, dim), jnp.float32)
        m = 0.1 * jax.random.normal(km, (1, dim), jnp.float32)
        v = jnp.abs(1.0 + 0.1 * jax.random.normal(kv, (1, dim), jnp.float32))
        return g, be, m, v

    g1, be1, m1, v1 = bn(ks[4], hidden)
    g2, be2, m2, v2 = bn(ks[5], hidden)

    return dict(w1=w1, b1=b1, g1=g1, be1=be1, m1=m1, v1=v1,
                w2=w2, b2=b2, g2=g2, be2=be2, m2=m2, v2=v2,
                w3=w3, b3=b3, w4=w4, b4=b4)


# ----------------------------------------------------------------------------
# References
# ----------------------------------------------------------------------------
def _reference_forward_f32(x, p):
    """Pure-JAX f32 reference matching the torch eval-mode forward (unfolded)."""
    h = jnp.maximum(x @ p["w1"] + p["b1"], 0.0)
    h = (h - p["m1"]) / jnp.sqrt(p["v1"] + BN_EPS) * p["g1"] + p["be1"]
    h = jnp.maximum(h @ p["w2"] + p["b2"], 0.0)
    h = (h - p["m2"]) / jnp.sqrt(p["v2"] + BN_EPS) * p["g2"] + p["be2"]
    h = jnp.maximum(h @ p["w3"] + p["b3"], 0.0)
    return jnp.maximum(h @ p["w4"] + p["b4"], 0.0)


def _reference_forward_packed(x, w_packed, b_packed):
    """Pure-JAX reference with the same bf16/folded numerics as the kernel."""
    batch, in_dim = x.shape
    h = jnp.zeros((batch, HIDDEN), jnp.bfloat16)
    h = h.at[:, :in_dim].set(x.astype(jnp.bfloat16))
    for i in range(NUM_LAYERS):
        acc = jnp.dot(h, w_packed[i], preferred_element_type=jnp.float32)
        acc = jnp.maximum(acc + b_packed[i], 0.0)
        h = acc.astype(jnp.bfloat16) if i < NUM_LAYERS - 1 else acc
    return h[:, :OUT_DIM]


if __name__ == "__main__":
    key = jax.random.PRNGKey(0)
    k_params, k_x = jax.random.split(key)

    params = init_params(k_params)
    x = jax.random.normal(k_x, (8, IN_DIM), jnp.float32)   # batch=8, 24 features

    # Fold BN + pack weights ONCE (kept out of the per-call path).
    w_packed, b_packed = fold_and_pack(params)

    out = neural_network_forward(x, w_packed, b_packed)
    out = jax.block_until_ready(out)
    assert out.shape == (8, OUT_DIM)

    # Exact-numerics check (same bf16 folded math as the kernel).
    ref_packed = _reference_forward_packed(x, w_packed, b_packed)
    assert jnp.allclose(out, ref_packed, atol=1e-4, rtol=1e-4), \
        "mismatch vs packed bf16 reference"

    # Sanity check against the full f32 eval-mode torch-equivalent forward
    # (loose tolerance accounts for the intentional bf16 weight cast).
    ref_f32 = _reference_forward_f32(x, params)
    assert jnp.allclose(out, ref_f32, atol=5e-2, rtol=5e-2), \
        "mismatch vs f32 eval reference"

    print("KERNEL_OK")
</pallas_src>

<mosaic_0001>
module attributes {stable_mosaic.version = 11 : i64} {
  func.func @_mlp_kernel(%arg0: memref<8x32xbf16, #tpu.memory_space<vmem>>, %arg1: memref<4x32x32xbf16, #tpu.memory_space<vmem>>, %arg2: memref<4x1x32xf32, #tpu.memory_space<vmem>>, %arg3: memref<8x32xf32, #tpu.memory_space<vmem>>) attributes {dimension_semantics = [], scalar_prefetch = 0 : i64, scratch_operands = 0 : i64, tpu.core_type = #tpu.core_type<tc>} {
    %c0 = arith.constant 0 : index
    %c0_0 = arith.constant 0 : index
    %0 = vector.load %arg0[%c0, %c0_0] : memref<8x32xbf16, #tpu.memory_space<vmem>>, vector<8x32xbf16>
    %c0_1 = arith.constant 0 : index
    %c0_2 = arith.constant 0 : index
    %c0_3 = arith.constant 0 : index
    %1 = vector.load %arg1[%c0_1, %c0_2, %c0_3] : memref<4x32x32xbf16, #tpu.memory_space<vmem>>, vector<1x32x32xbf16>
    %2 = vector.shape_cast %1 : vector<1x32x32xbf16> to vector<32x32xbf16>
    %cst = arith.constant dense<0.000000e+00> : vector<8x32xf32>
    %3 = tpu.matmul %0, %2, %cst {dimension_numbers = #tpu.dot_dimension_numbers<[1], [0], [0], [1], [0, 0, 1, 1], [], []>} : vector<8x32xbf16>, vector<32x32xbf16>, vector<8x32xf32> -> vector<8x32xf32>
    %c0_4 = arith.constant 0 : index
    %c0_5 = arith.constant 0 : index
    %c0_6 = arith.constant 0 : index
    %4 = vector.load %arg2[%c0_4, %c0_5, %c0_6] : memref<4x1x32xf32, #tpu.memory_space<vmem>>, vector<1x1x32xf32>
    %5 = vector.shape_cast %4 : vector<1x1x32xf32> to vector<1x32xf32>
    %6 = vector.broadcast %5 : vector<1x32xf32> to vector<8x32xf32>
    %7 = arith.addf %3, %6 : vector<8x32xf32>
    %cst_7 = arith.constant 0.000000e+00 : f32
    %8 = vector.broadcast %cst_7 : f32 to vector<8x32xf32>
    %9 = arith.maximumf %7, %8 : vector<8x32xf32>
    %10 = arith.truncf %9 : vector<8x32xf32> to vector<8x32xbf16>
    %c1 = arith.constant 1 : index
    %c0_8 = arith.constant 0 : index
    %c0_9 = arith.constant 0 : index
    %11 = vector.load %arg1[%c1, %c0_8, %c0_9] : memref<4x32x32xbf16, #tpu.memory_space<vmem>>, vector<1x32x32xbf16>
    %12 = vector.shape_cast %11 : vector<1x32x32xbf16> to vector<32x32xbf16>
    %cst_10 = arith.constant dense<0.000000e+00> : vector<8x32xf32>
    %13 = tpu.matmul %10, %12, %cst_10 {dimension_numbers = #tpu.dot_dimension_numbers<[1], [0], [0], [1], [0, 0, 1, 1], [], []>} : vector<8x32xbf16>, vector<32x32xbf16>, vector<8x32xf32> -> vector<8x32xf32>
    %c1_11 = arith.constant 1 : index
    %c0_12 = arith.constant 0 : index
    %c0_13 = arith.constant 0 : index
    %14 = vector.load %arg2[%c1_11, %c0_12, %c0_13] : memref<4x1x32xf32, #tpu.memory_space<vmem>>, vector<1x1x32xf32>
    %15 = vector.shape_cast %14 : vector<1x1x32xf32> to vector<1x32xf32>
    %16 = vector.broadcast %15 : vector<1x32xf32> to vector<8x32xf32>
    %17 = arith.addf %13, %16 : vector<8x32xf32>
    %cst_14 = arith.constant 0.000000e+00 : f32
    %18 = vector.broadcast %cst_14 : f32 to vector<8x32xf32>
    %19 = arith.maximumf %17, %18 : vector<8x32xf32>
    %20 = arith.truncf %19 : vector<8x32xf32> to vector<8x32xbf16>
    %c2 = arith.constant 2 : index
    %c0_15 = arith.constant 0 : index
    %c0_16 = arith.constant 0 : index
    %21 = vector.load %arg1[%c2, %c0_15, %c0_16] : memref<4x32x32xbf16, #tpu.memory_space<vmem>>, vector<1x32x32xbf16>
    %22 = vector.shape_cast %21 : vector<1x32x32xbf16> to vector<32x32xbf16>
    %cst_17 = arith.constant dense<0.000000e+00> : vector<8x32xf32>
    %23 = tpu.matmul %20, %22, %cst_17 {dimension_numbers = #tpu.dot_dimension_numbers<[1], [0], [0], [1], [0, 0, 1, 1], [], []>} : vector<8x32xbf16>, vector<32x32xbf16>, vector<8x32xf32> -> vector<8x32xf32>
    %c2_18 = arith.constant 2 : index
    %c0_19 = arith.constant 0 : index
    %c0_20 = arith.constant 0 : index
    %24 = vector.load %arg2[%c2_18, %c0_19, %c0_20] : memref<4x1x32xf32, #tpu.memory_space<vmem>>, vector<1x1x32xf32>
    %25 = vector.shape_cast %24 : vector<1x1x32xf32> to vector<1x32xf32>
    %26 = vector.broadcast %25 : vector<1x32xf32> to vector<8x32xf32>
    %27 = arith.addf %23, %26 : vector<8x32xf32>
    %cst_21 = arith.constant 0.000000e+00 : f32
    %28 = vector.broadcast %cst_21 : f32 to vector<8x32xf32>
    %29 = arith.maximumf %27, %28 : vector<8x32xf32>
    %30 = arith.truncf %29 : vector<8x32xf32> to vector<8x32xbf16>
    %c3 = arith.constant 3 : index
    %c0_22 = arith.constant 0 : index
    %c0_23 = arith.constant 0 : index
    %31 = vector.load %arg1[%c3, %c0_22, %c0_23] : memref<4x32x32xbf16, #tpu.memory_space<vmem>>, vector<1x32x32xbf16>
    %32 = vector.shape_cast %31 : vector<1x32x32xbf16> to vector<32x32xbf16>
    %cst_24 = arith.constant dense<0.000000e+00> : vector<8x32xf32>
    %33 = tpu.matmul %30, %32, %cst_24 {dimension_numbers = #tpu.dot_dimension_numbers<[1], [0], [0], [1], [0, 0, 1, 1], [], []>} : vector<8x32xbf16>, vector<32x32xbf16>, vector<8x32xf32> -> vector<8x32xf32>
    %c3_25 = arith.constant 3 : index
    %c0_26 = arith.constant 0 : index
    %c0_27 = arith.constant 0 : index
    %34 = vector.load %arg2[%c3_25, %c0_26, %c0_27] : memref<4x1x32xf32, #tpu.memory_space<vmem>>, vector<1x1x32xf32>
    %35 = vector.shape_cast %34 : vector<1x1x32xf32> to vector<1x32xf32>
    %36 = vector.broadcast %35 : vector<1x32xf32> to vector<8x32xf32>
    %37 = arith.addf %33, %36 : vector<8x32xf32>
    %cst_28 = arith.constant 0.000000e+00 : f32
    %38 = vector.broadcast %cst_28 : f32 to vector<8x32xf32>
    %39 = arith.maximumf %37, %38 : vector<8x32xf32>
    %c0_29 = arith.constant 0 : index
    %c0_30 = arith.constant 0 : index
    %40 = vector.load %arg3[%c0_29, %c0_30] : memref<8x32xf32, #tpu.memory_space<vmem>>, vector<8x32xf32>
    tpu.vector_store %arg3[%c0_29, %c0_30], %39 {strides = array<i32>} : memref<8x32xf32, #tpu.memory_space<vmem>>, vector<8x32xf32>,
    return
  }
}

</mosaic_0001>

<bundles_post_ra>
// kernel: neural_network_forward.1
= control target key start
LH: loop header
LB: loop body
LE: loop exit
PB: predicated region body
PF: predicated region fallthrough
CT: control target
= control target key end

     0   :  { %8 = vsyncpa [#allocation3], 0  ;;  %s412_s12 = smov [#allocation2]   ;;  %s467_s0 = inlined_call_operand.vmem [shape: bf16[8,32], index: 0, kind: input, shape index: {}]   ;;  %s468_s1 = inlined_call_operand.hbm [shape: bf16[4,32,32], index: 1, kind: input, shape index: {}]   ;;  %s469_s2 = inlined_call_operand.vmem [shape: f32[4,1,32], index: 2, kind: input, shape index: {}]   ;;  %s470_s3 = inlined_call_operand.vmem [shape: f32[8,32], index: 3, kind: output, shape index: {}]  }
   0x1   :  { %s16_s13 = sshll.u32 %s412_s12, 4  ;;  %s17_s13 = int_to_ptr.vmem [resolvable:$true] %s16_s13 }
   0x2   :  { %s398_s14 = scalar_lea.vmem %s17_s13, 1024  ;;  %p403_p1 = scmp.lt.s32.totalorder %s17_s13, %s17_s13 }
   0x3   :  { %p399_p0 = scmp.ne.s32.totalorder %s17_s13, %s398_s14  ;;  %p404_p2 = scmp.lt.s32.totalorder %s398_s14, %s398_s14 }
   0x5   :  { %p405_p3 = por %p404_p2, %p403_p1 }
   0x7   :  { %p406_p4 = pnand %p405_p3, %p399_p0 }
   0x9   :  { %409 = shalt.err (!%p406_p4)
}
   0xa   :  { %s413_s15 = smov 64   ;;  %s414_s16 = smov 4  }
   0xb   :  { %22 = dma.hbm_to_vmem [thread:$0]  %s468_s1, 1024, %s17_s13, [#allocation3], %s413_s15, %s413_s15, %s414_s16  }
   0xc   :  { %410 = dma.done.wait [#allocation3], 1024  }
   0xd   :  { %411 = vsyncadd [#allocation3], 4294966272  ;;  %v415_v0 = vmov 0.0   ;;  %vm416_vm0 = vmmov 0   ;;  %v382_v1 = vld [vmem:[#allocation2 + $0x8] sm:$0xff]   ;;  %v383_v2 = vld [vmem:[#allocation2] sm:$0xff]  }
   0xe   :  { %345 = vmatprep.subr.bf16.mxu0 %v415_v0  ;;  %349 = vmatprep.mubr.msk.bf16.mxu0 %vm416_vm0, %v415_v0  ;;  %vm53_vm1 = vcmask 261120   ;;  %v29_v3 = vld [vmem:[%s467_s0] sm:$0xf]  ;;  %v384_v4 = vld [vmem:[#allocation2 + $0x18] sm:$0xff]   ;;  %v385_v5 = vld [vmem:[#allocation2 + $0x10] sm:$0xff]  }
   0xf   :  { %353 = vmatprep.subr.bf16.mxu1 %v415_v0  ;;  %357 = vmatprep.mubr.msk.bf16.mxu1 %vm416_vm0, %v415_v0  ;;  %v386_v6 = vld [vmem:[#allocation2 + $0x28] sm:$0xff]   ;;  %v314_v7 = vld [vmem:[%s469_s2] ss:$0 sm:$0xff]  ;;  %v388_v16 = vld [vmem:[#allocation2 + $0x38] sm:$0xff]  }
  0x10   :  { %346 = vmatpush3.bf16.msra.mxu0 %v382_v1  ;;  %354 = vmatpush3.bf16.msra.mxu1 %v384_v4  ;;  %v387_v15 = vld [vmem:[#allocation2 + $0x20] sm:$0xff]   ;;  %v389_v25 = vld [vmem:[#allocation2 + $0x30] sm:$0xff]  }
  0x11   :  { %347 = vmatprep.subr.bf16.mxu0 %v415_v0  ;;  %355 = vmatprep.subr.bf16.mxu1 %v415_v0  ;;  %v319_v17 = vld [vmem:[%s469_s2 + $0x1] ss:$0 sm:$0xff]  ;;  %v324_v26 = vld [vmem:[%s469_s2 + $0x2] ss:$0 sm:$0xff]  ;;  %v329_v34 = vld [vmem:[%s469_s2 + $0x3] ss:$0 sm:$0xff] }
  0x14   :  { %348 = vmatpush3.bf16.msra.mxu0 %v383_v2  ;;  %356 = vmatpush3.bf16.msra.mxu1 %v385_v5 }
  0x15   :  { %361 = vmatprep.subr.bf16.mxu0 %v415_v0  ;;  %369 = vmatprep.subr.bf16.mxu1 %v415_v0 }
  0x17   :  { %350 = vmatmul.mubr.msk.bf16.vlgmr.msra.gmra.mxu0 %vm53_vm1, %v29_v3 }
  0x18   :  { %365 = vmatprep.mubr.msk.bf16.mxu0 %vm416_vm0, %v415_v0  ;;  %362 = vmatpush3.bf16.msra.mxu0 %v386_v6 }
  0x19   :  { %363 = vmatprep.subr.bf16.mxu0 %v415_v0 }
  0x1c   :  { %364 = vmatpush3.bf16.msra.mxu0 %v387_v15 }
  0xd7   :  { %v91_v8 = vpop.f32.mrf.mxu0 }
  0xd8   :  { %v92_v9 = vadd.f32 %v314_v7, %v91_v8 }
  0xd9   :  { %v351_v10 = vpop.f32.mrf.mxu0 }
  0xda   :  { %v97_v11 = vmax.f32 %v92_v9, 0.0 }
  0xdb   :  { %v94_v12 = vpop.f32.mrf.mxu0 }
  0xdc   :  { %v98_v13 = vpack.c.bf16 %v97_v11, %v97_v11 }
  0xdd   :  { %v352_v14 = vpop.f32.mrf.mxu0 }
  0xde   :  { %358 = vmatmul.mubr.msk.bf16.vlgmr.msra.gmra.mxu1 %vm53_vm1, %v98_v13 }
  0xdf   :  { %373 = vmatprep.mubr.msk.bf16.mxu1 %vm416_vm0, %v415_v0  ;;  %370 = vmatpush3.bf16.msra.mxu1 %v388_v16 }
  0xe0   :  { %371 = vmatprep.subr.bf16.mxu1 %v415_v0 }
  0xe3   :  { %372 = vmatpush3.bf16.msra.mxu1 %v389_v25 }
 0x19e   :  { %v161_v18 = vpop.f32.mrf.mxu1 }
 0x19f   :  { %v162_v19 = vadd.f32 %v319_v17, %v161_v18 }
 0x1a0   :  { %v359_v20 = vpop.f32.mrf.mxu1 }
 0x1a1   :  { %v167_v21 = vmax.f32 %v162_v19, 0.0 }
 0x1a2   :  { %v164_v22 = vpop.f32.mrf.mxu1 }
 0x1a3   :  { %v168_v23 = vpack.c.bf16 %v167_v21, %v167_v21 }
 0x1a4   :  { %v360_v24 = vpop.f32.mrf.mxu1 }
 0x1a5   :  { %366 = vmatmul.mubr.msk.bf16.vlgmr.msra.gmra.mxu0 %vm53_vm1, %v168_v23 }
 0x265   :  { %v231_v27 = vpop.f32.mrf.mxu0 }
 0x266   :  { %v232_v28 = vadd.f32 %v324_v26, %v231_v27 }
 0x267   :  { %v367_v29 = vpop.f32.mrf.mxu0 }
 0x268   :  { %v237_v30 = vmax.f32 %v232_v28, 0.0 }
 0x269   :  { %v234_v31 = vpop.f32.mrf.mxu0 }
 0x26a   :  { %v238_v32 = vpack.c.bf16 %v237_v30, %v237_v30 }
 0x26b   :  { %v368_v33 = vpop.f32.mrf.mxu0 }
 0x26c   :  { %374 = vmatmul.mubr.msk.bf16.vlgmr.msra.gmra.mxu1 %vm53_vm1, %v238_v32 }
 0x32c   :  { %v301_v35 = vpop.f32.mrf.mxu1 }
 0x32d   :  { %v302_v36 = vadd.f32 %v329_v34, %v301_v35 }
 0x32e   :  { %v375_v37 = vpop.f32.mrf.mxu1 }
 0x32f   :  { %v307_v38 = vmax.f32 %v302_v36, 0.0 }
 0x330   :  { %v304_v39 = vpop.f32.mrf.mxu1 }
 0x331   :  { %308 = vst.msk [vmem:[%s470_s3] sm:$0xff] %vm53_vm1, %v307_v38 }
 0x332   :  { %v376_v40 = vpop.f32.mrf.mxu1 }
 0x333   :  { %313 = vsyncpa [#allocation3], 1 }

</bundles_post_ra>
